<compile_context>
chip_gen: v7x
topology: tpu7x:2x2x1
jax: 0.10.0
libtpu: 0.0.40
codegen_flags: <defaults>
</compile_context>

<pallas_src>
import functools
import math

import jax
import jax.numpy as jnp
from jax.experimental import pallas as pl
from jax.experimental.pallas import tpu as pltpu


# ---------------------------------------------------------------------------
# Kernels
# ---------------------------------------------------------------------------
def _ffn_resident_kernel(x_ref, w1_ref, b1_ref, w2_ref, b2_ref, o_ref):
    """Whole d_ff in one shot; weights stay VMEM-resident across all M tiles."""
    h = jnp.dot(x_ref[...], w1_ref[...], preferred_element_type=jnp.float32)
    h = jnp.maximum(h + b1_ref[...].astype(jnp.float32), 0.0)
    o = jnp.dot(h.astype(w2_ref.dtype), w2_ref[...],
                preferred_element_type=jnp.float32)
    o_ref[...] = (o + b2_ref[...].astype(jnp.float32)).astype(o_ref.dtype)


def _ffn_tiled_kernel_f32out(x_ref, w1_ref, b1_ref, w2_ref, b2_ref, o_ref):
    """d_ff-tiled reduction; f32 output accumulates directly in o_ref."""
    kf = pl.program_id(1)
    h = jnp.dot(x_ref[...], w1_ref[...], preferred_element_type=jnp.float32)
    h = jnp.maximum(h + b1_ref[...].astype(jnp.float32), 0.0)
    p = jnp.dot(h.astype(w2_ref.dtype), w2_ref[...],
                preferred_element_type=jnp.float32)

    @pl.when(kf == 0)
    def _first():
        # b2 folded into the first partial -- no zero-init, no finalize pass.
        o_ref[...] = p + b2_ref[...].astype(jnp.float32)

    @pl.when(kf > 0)
    def _rest():
        o_ref[...] += p


def _ffn_tiled_kernel_scratch(x_ref, w1_ref, b1_ref, w2_ref, b2_ref, o_ref,
                              acc_ref):
    """d_ff-tiled reduction with an f32 scratch for narrow output dtypes."""
    kf = pl.program_id(1)
    h = jnp.dot(x_ref[...], w1_ref[...], preferred_element_type=jnp.float32)
    h = jnp.maximum(h + b1_ref[...].astype(jnp.float32), 0.0)
    p = jnp.dot(h.astype(w2_ref.dtype), w2_ref[...],
                preferred_element_type=jnp.float32)

    @pl.when(kf == 0)
    def _first():
        acc_ref[...] = p + b2_ref[...].astype(jnp.float32)

    @pl.when(kf > 0)
    def _rest():
        acc_ref[...] += p

    @pl.when(kf == pl.num_programs(1) - 1)
    def _finalize():
        o_ref[...] = acc_ref[...].astype(o_ref.dtype)


# ---------------------------------------------------------------------------
# Sizing helpers (all trace-time / static)
# ---------------------------------------------------------------------------
def _round_up(x: int, m: int) -> int:
    return -(-x // m) * m


def _sublane(dtype) -> int:
    # Sub-32-bit dtypes pack along sublanes: 8 for f32, 16 for bf16, 32 for i8.
    return max(8, 32 // jnp.dtype(dtype).itemsize)


def _balanced_tile(total: int, cap: int, align: int) -> int:
    """Largest tile <= ~cap (align-multiple) that minimizes padding of total."""
    if total <= cap:
        return _round_up(total, align)
    n_tiles = -(-total // cap)
    return _round_up(-(-total // n_tiles), align)


def _vmem_plan():
    """(vmem_limit_bytes, tile budget bytes) sized per TPU generation."""
    try:
        cap = pltpu.get_tpu_info().vmem_capacity_bytes
    except Exception:
        cap = 64 * 1024 * 1024  # conservative fallback (valid everywhere)
    if cap >= 96 * 1024 * 1024:           # v5e / v6e: 128 MiB physical
        return 100 * 1024 * 1024, 88 * 1024 * 1024
    return 56 * 1024 * 1024, 44 * 1024 * 1024   # v7x: 64 MiB -- leave headroom


def _pad2d(a, rows: int, cols: int):
    pr, pc = rows - a.shape[0], cols - a.shape[1]
    if pr == 0 and pc == 0:               # skip the pad op when already aligned
        return a
    return jnp.pad(a, ((0, pr), (0, pc)))


# ---------------------------------------------------------------------------
# Wrapper
# ---------------------------------------------------------------------------
@functools.partial(jax.jit, static_argnames=("compute_dtype", "_force_path"))
def feed_forward(x, w1, b1, w2, b2, *, compute_dtype=None, _force_path=None):
    """x: (..., d_model); w1: (d_model, d_ff); w2: (d_ff, d_model).

    Weights are stored pre-transposed as (in, out) vs PyTorch's (out, in).
    compute_dtype: optionally cast x/W1/W2 (e.g. jnp.bfloat16) for MXU rate and
    halved HBM traffic; accumulation stays f32 and the output keeps x's dtype.
    """
    out_dtype = x.dtype
    if compute_dtype is not None:
        x = x.astype(compute_dtype)
        w1 = w1.astype(compute_dtype)
        w2 = w2.astype(compute_dtype)

    d_model = x.shape[-1]
    d_ff = w1.shape[1]
    lead = x.shape[:-1]
    m = math.prod(lead) if lead else 1
    x2d = x.reshape(m, d_model)

    x_it = jnp.dtype(x.dtype).itemsize
    w_it = jnp.dtype(w1.dtype).itemsize
    o_it = jnp.dtype(out_dtype).itemsize
    sub = max(_sublane(x.dtype), _sublane(out_dtype))
    f32_out = jnp.dtype(out_dtype) == jnp.dtype(jnp.float32)

    vmem_limit, budget = _vmem_plan()
    d_model_p = _round_up(d_model, 128)       # lane-dense stores
    d_ff_128 = _round_up(d_ff, 128)

    # ----- path choice: weights resident in VMEM vs d_ff-tiled reduction -----
    # Count 2x (double buffers) for everything fed through a BlockSpec.
    resident_w_bytes = 2 * (2 * d_model_p * d_ff_128 * w_it
                            + (d_ff_128 + d_model_p) * 4)
    resident_row = d_model_p * (2 * x_it + 2 * o_it) + d_ff_128 * (4 + w_it)
    use_resident = (resident_w_bytes <= budget // 2
                    and budget - resident_w_bytes >= sub * resident_row)
    if _force_path == "resident":
        use_resident = True
    elif _force_path == "tiled":
        use_resident = False

    if use_resident:
        # -------- P1: single grid axis over M; W1/W2 DMA'd exactly once ------
        d_ff_p = d_ff_128
        tm_cap = max(sub, min((budget - resident_w_bytes) // resident_row, 1024))
        tm = _balanced_tile(m, tm_cap, sub)
        m_p = _round_up(m, tm)
        grid = (m_p // tm,)
        kernel = _ffn_resident_kernel
        in_specs = [
            pl.BlockSpec((tm, d_model_p), lambda i: (i, 0)),        # x
            pl.BlockSpec((d_model_p, d_ff_p), lambda i: (0, 0)),    # w1 resident
            pl.BlockSpec((1, d_ff_p), lambda i: (0, 0)),            # b1 resident
            pl.BlockSpec((d_ff_p, d_model_p), lambda i: (0, 0)),    # w2 resident
            pl.BlockSpec((1, d_model_p), lambda i: (0, 0)),         # b2 resident
        ]
        out_specs = pl.BlockSpec((tm, d_model_p), lambda i: (i, 0))
        scratch_shapes = []
        # TODO(synk): on v7x megacore, when grid[0] == 1 (decode-sized m) add a
        # parallel axis over the output d_model so both TensorCores are used.
        dim_sem = ("parallel",)
    else:
        # -------- P3: accumulate over d_ff tiles (reduction axis last) -------
        # Cap tf so double-buffered W1+W2 tiles stay under half the budget.
        tf_budget_cap = max(128, ((budget // 2) // (4 * d_model_p * w_it))
                            // 128 * 128)
        # TODO(synk): for d_model >= ~8k even tf=128 exceeds v7x's 64 MiB VMEM;
        # add a d_model grid axis (tile the 2nd matmul's output dim) there.
        tf = _balanced_tile(d_ff, min(512, tf_budget_cap), 128)
        d_ff_p = _round_up(d_ff, tf)
        fixed = 4 * d_model_p * tf * w_it + 2 * (tf + d_model_p) * 4
        acc_bytes = (2 * 4) if f32_out else (4 + 2 * o_it)
        tiled_row = d_model_p * (2 * x_it + acc_bytes) + tf * (4 + w_it)
        tm_cap = max(sub, min((budget - fixed) // tiled_row, 2048))
        tm = _balanced_tile(m, tm_cap, sub)
        m_p = _round_up(m, tm)
        grid = (m_p // tm, d_ff_p // tf)
        kernel = (_ffn_tiled_kernel_f32out if f32_out
                  else _ffn_tiled_kernel_scratch)
        in_specs = [
            pl.BlockSpec((tm, d_model_p), lambda i, kf: (i, 0)),    # x
            pl.BlockSpec((d_model_p, tf), lambda i, kf: (0, kf)),   # w1
            pl.BlockSpec((1, tf), lambda i, kf: (0, kf)),           # b1
            pl.BlockSpec((tf, d_model_p), lambda i, kf: (kf, 0)),   # w2
            pl.BlockSpec((1, d_model_p), lambda i, kf: (0, 0)),     # b2
        ]
        out_specs = pl.BlockSpec((tm, d_model_p), lambda i, kf: (i, 0))
        scratch_shapes = ([] if f32_out
                          else [pltpu.VMEM((tm, d_model_p), jnp.float32)])
        dim_sem = ("parallel", "arbitrary")

    # ----- zero-pad only when needed (inert for the math) -----
    x_p = _pad2d(x2d, m_p, d_model_p)
    w1_p = _pad2d(w1, d_model_p, d_ff_p)
    b1_p = _pad2d(b1.reshape(1, d_ff), 1, d_ff_p)
    w2_p = _pad2d(w2, d_ff_p, d_model_p)
    b2_p = _pad2d(b2.reshape(1, d_model), 1, d_model_p)

    # Advisory cost estimate for XLA's scheduler.
    n_m_tiles = m_p // tm
    w_bytes = 2 * d_model_p * d_ff_p * w_it + (d_ff_p + d_model_p) * 4
    weight_stream = w_bytes if use_resident else n_m_tiles * w_bytes
    cost = pl.CostEstimate(
        flops=4 * m * d_ff * d_model,            # two matmuls, 2*M*K*N each
        transcendentals=0,
        bytes_accessed=int(m_p * d_model_p * (x_it + o_it) + weight_stream),
    )

    out = pl.pallas_call(
        kernel,
        out_shape=jax.ShapeDtypeStruct((m_p, d_model_p), out_dtype),
        grid_spec=pltpu.PrefetchScalarGridSpec(
            num_scalar_prefetch=0,
            grid=grid,
            in_specs=in_specs,
            out_specs=out_specs,
            scratch_shapes=scratch_shapes,
        ),
        compiler_params=pltpu.CompilerParams(
            dimension_semantics=dim_sem,
            vmem_limit_bytes=vmem_limit,
        ),
        cost_estimate=cost,
    )(x_p, w1_p, b1_p, w2_p, b2_p)

    out = out[:m, :d_model]
    return out.reshape(*lead, d_model)


# ---------------------------------------------------------------------------
# Parameters / reference
# ---------------------------------------------------------------------------
def init_params(key, d_ff, d_model, dtype=jnp.float32):
    """Deterministic init mimicking nn.Linear defaults (uniform +-1/sqrt(fan_in))."""
    k1, k2, k3, k4 = jax.random.split(key, 4)
    bound1 = 1.0 / (d_model ** 0.5)
    bound2 = 1.0 / (d_ff ** 0.5)
    # Stored as (in, out) == transpose of PyTorch's (out, in) weight.
    w1 = jax.random.uniform(k1, (d_model, d_ff), dtype, -bound1, bound1)
    b1 = jax.random.uniform(k2, (d_ff,), dtype, -bound1, bound1)
    w2 = jax.random.uniform(k3, (d_ff, d_model), dtype, -bound2, bound2)
    b2 = jax.random.uniform(k4, (d_model,), dtype, -bound2, bound2)
    return w1, b1, w2, b2


def _reference(x, w1, b1, w2, b2):
    with jax.default_matmul_precision("float32"):
        return jnp.maximum(x @ w1 + b1, 0.0) @ w2 + b2


if __name__ == "__main__":
    key = jax.random.PRNGKey(0)
    kx, kp, kx2, kp2 = jax.random.split(key, 4)

    # 1) Small shape (exercises padding + the weight-resident single-axis path).
    B, S, d_model, d_ff = 2, 8, 32, 64
    x = jax.random.normal(kx, (B, S, d_model), jnp.float32)
    w1, b1, w2, b2 = init_params(kp, d_ff, d_model)
    out = jax.block_until_ready(feed_forward(x, w1, b1, w2, b2))
    ref = _reference(x, w1, b1, w2, b2)
    assert out.shape == (B, S, d_model)
    assert jnp.allclose(out, ref, atol=1e-4, rtol=1e-4)

    # 2) Larger shape, forced d_ff-tiled reduction path (f32 output accumulates
    #    directly in the VMEM-resident output block; multi-tile kf grid).
    B2, S2, d_model2, d_ff2 = 2, 160, 256, 1024
    x2 = jax.random.normal(kx2, (B2, S2, d_model2), jnp.float32)
    p2 = init_params(kp2, d_ff2, d_model2)
    out2 = jax.block_until_ready(feed_forward(x2, *p2, _force_path="tiled"))
    ref2 = _reference(x2, *p2)
    assert out2.shape == (B2, S2, d_model2)
    assert jnp.allclose(out2, ref2, atol=1e-3, rtol=1e-3)

    # 3) Same shape in bf16, forced tiled path (exercises the f32 scratch
    #    accumulator kernel and the bf16 MXU path).
    xb = x2.astype(jnp.bfloat16)
    pb = tuple(p.astype(jnp.bfloat16) for p in p2)
    out3 = jax.block_until_ready(feed_forward(xb, *pb, _force_path="tiled"))
    ref3 = _reference(xb.astype(jnp.float32),
                      *(p.astype(jnp.float32) for p in pb))
    assert out3.dtype == jnp.bfloat16
    assert jnp.allclose(out3.astype(jnp.float32), ref3, atol=1e-1, rtol=5e-2)

    print("KERNEL_OK")
</pallas_src>

<mosaic_0001>
module attributes {stable_mosaic.version = 11 : i64} {
  func.func @_ffn_resident_kernel(%arg0: i32, %arg1: memref<16x128xf32, #tpu.memory_space<vmem>>, %arg2: memref<128x128xf32, #tpu.memory_space<vmem>>, %arg3: memref<1x128xf32, #tpu.memory_space<vmem>>, %arg4: memref<128x128xf32, #tpu.memory_space<vmem>>, %arg5: memref<1x128xf32, #tpu.memory_space<vmem>>, %arg6: memref<16x128xf32, #tpu.memory_space<vmem>>) attributes {dimension_semantics = [#tpu.dimension_semantics<parallel>], iteration_bounds = array<i64: 1>, scalar_prefetch = 0 : i64, scratch_operands = 0 : i64, tpu.core_type = #tpu.core_type<tc>, window_params = [{transform_indices = @transform_0, window_bounds = array<i64: 16, 128>}, {pipeline_mode = #tpu.pipeline_mode<synchronous>, transform_indices = @transform_1, window_bounds = array<i64: 128, 128>}, {pipeline_mode = #tpu.pipeline_mode<synchronous>, transform_indices = @transform_2, window_bounds = array<i64: 1, 128>}, {pipeline_mode = #tpu.pipeline_mode<synchronous>, transform_indices = @transform_3, window_bounds = array<i64: 128, 128>}, {pipeline_mode = #tpu.pipeline_mode<synchronous>, transform_indices = @transform_4, window_bounds = array<i64: 1, 128>}, {transform_indices = @transform_5, window_bounds = array<i64: 16, 128>}]} {
    %c0 = arith.constant 0 : index
    %c0_0 = arith.constant 0 : index
    %0 = vector.load %arg1[%c0, %c0_0] : memref<16x128xf32, #tpu.memory_space<vmem>>, vector<16x128xf32>
    %c0_1 = arith.constant 0 : index
    %c0_2 = arith.constant 0 : index
    %1 = vector.load %arg2[%c0_1, %c0_2] : memref<128x128xf32, #tpu.memory_space<vmem>>, vector<128x128xf32>
    %cst = arith.constant dense<0.000000e+00> : vector<16x128xf32>
    %2 = tpu.matmul %0, %1, %cst {dimension_numbers = #tpu.dot_dimension_numbers<[1], [0], [0], [1], [0, 0, 1, 1], [], []>} : vector<16x128xf32>, vector<128x128xf32>, vector<16x128xf32> -> vector<16x128xf32>
    %c0_3 = arith.constant 0 : index
    %c0_4 = arith.constant 0 : index
    %3 = vector.load %arg3[%c0_3, %c0_4] : memref<1x128xf32, #tpu.memory_space<vmem>>, vector<1x128xf32>
    %4 = vector.broadcast %3 : vector<1x128xf32> to vector<16x128xf32>
    %5 = arith.addf %2, %4 : vector<16x128xf32>
    %cst_5 = arith.constant 0.000000e+00 : f32
    %6 = vector.broadcast %cst_5 : f32 to vector<16x128xf32>
    %7 = arith.maximumf %5, %6 : vector<16x128xf32>
    %c0_6 = arith.constant 0 : index
    %c0_7 = arith.constant 0 : index
    %8 = vector.load %arg4[%c0_6, %c0_7] : memref<128x128xf32, #tpu.memory_space<vmem>>, vector<128x128xf32>
    %cst_8 = arith.constant dense<0.000000e+00> : vector<16x128xf32>
    %9 = tpu.matmul %7, %8, %cst_8 {dimension_numbers = #tpu.dot_dimension_numbers<[1], [0], [0], [1], [0, 0, 1, 1], [], []>} : vector<16x128xf32>, vector<128x128xf32>, vector<16x128xf32> -> vector<16x128xf32>
    %c0_9 = arith.constant 0 : index
    %c0_10 = arith.constant 0 : index
    %10 = vector.load %arg5[%c0_9, %c0_10] : memref<1x128xf32, #tpu.memory_space<vmem>>, vector<1x128xf32>
    %11 = vector.broadcast %10 : vector<1x128xf32> to vector<16x128xf32>
    %12 = arith.addf %9, %11 : vector<16x128xf32>
    %c0_11 = arith.constant 0 : index
    %c0_12 = arith.constant 0 : index
    %13 = vector.load %arg6[%c0_11, %c0_12] : memref<16x128xf32, #tpu.memory_space<vmem>>, vector<16x128xf32>
    tpu.vector_store %arg6[%c0_11, %c0_12], %12 {strides = array<i32>} : memref<16x128xf32, #tpu.memory_space<vmem>>, vector<16x128xf32>,
    return
  }
  func.func @transform_0(%arg0: i32) -> (i32, i32) {
    %c0_i32 = arith.constant 0 : i32
    %c0_i32_0 = arith.constant 0 : i32
    return %arg0, %c0_i32 : i32, i32
  }
  func.func @transform_1(%arg0: i32) -> (i32, i32) {
    %c0_i32 = arith.constant 0 : i32
    %c0_i32_0 = arith.constant 0 : i32
    %c0_i32_1 = arith.constant 0 : i32
    return %c0_i32, %c0_i32_0 : i32, i32
  }
  func.func @transform_2(%arg0: i32) -> (i32, i32) {
    %c0_i32 = arith.constant 0 : i32
    %c0_i32_0 = arith.constant 0 : i32
    %c0_i32_1 = arith.constant 0 : i32
    return %c0_i32, %c0_i32_0 : i32, i32
  }
  func.func @transform_3(%arg0: i32) -> (i32, i32) {
    %c0_i32 = arith.constant 0 : i32
    %c0_i32_0 = arith.constant 0 : i32
    %c0_i32_1 = arith.constant 0 : i32
    return %c0_i32, %c0_i32_0 : i32, i32
  }
  func.func @transform_4(%arg0: i32) -> (i32, i32) {
    %c0_i32 = arith.constant 0 : i32
    %c0_i32_0 = arith.constant 0 : i32
    %c0_i32_1 = arith.constant 0 : i32
    return %c0_i32, %c0_i32_0 : i32, i32
  }
  func.func @transform_5(%arg0: i32) -> (i32, i32) {
    %c0_i32 = arith.constant 0 : i32
    %c0_i32_0 = arith.constant 0 : i32
    return %arg0, %c0_i32 : i32, i32
  }
}

</mosaic_0001>

<bundles_post_ra>
// kernel: feed_forward.1
= control target key start
LH: loop header
LB: loop body
LE: loop exit
PB: predicated region body
PF: predicated region fallthrough
CT: control target
= control target key end

     0   :  { %s542_s1 = inlined_call_operand.vmem [shape: f32[128,128], index: 1, kind: input, shape index: {}]   ;;  %s543_s0 = inlined_call_operand.vmem [shape: f32[16,128], index: 0, kind: input, shape index: {}]   ;;  %s544_s3 = inlined_call_operand.vmem [shape: f32[128,128], index: 3, kind: input, shape index: {}]   ;;  %s545_s2 = inlined_call_operand.vmem [shape: f32[1,128], index: 2, kind: input, shape index: {}]   ;;  %s546_s4 = inlined_call_operand.vmem [shape: f32[1,128], index: 4, kind: input, shape index: {}]   ;;  %s547_s5 = inlined_call_operand.vmem [shape: f32[16,128], index: 5, kind: output, shape index: {}]  }
   0x1   :  { %v22_v0 = vld [vmem:[%s542_s1] sm:$0xff]  ;;  %v23_v1 = vld [vmem:[%s542_s1 + $0x8] sm:$0xff]  ;;  %v24_v2 = vld [vmem:[%s542_s1 + $0x10] sm:$0xff] }
   0x2   :  { %v334_v3 = vpack.c.bf16 %v23_v1, %v22_v0  ;;  %v25_v4 = vld [vmem:[%s542_s1 + $0x18] sm:$0xff]  ;;  %v26_v6 = vld [vmem:[%s542_s1 + $0x20] sm:$0xff]  ;;  %v27_v7 = vld [vmem:[%s542_s1 + $0x28] sm:$0xff] }
   0x3   :  { %v338_v5 = vpack.c.bf16 %v25_v4, %v24_v2  ;;  %v342_v8 = vpack.c.bf16 %v27_v7, %v26_v6  ;;  %v28_v9 = vld [vmem:[%s542_s1 + $0x30] sm:$0xff]  ;;  %v29_v10 = vld [vmem:[%s542_s1 + $0x38] sm:$0xff]  ;;  %v20_v11 = vld [vmem:[%s543_s0] sm:$0xff] }
   0x4   :  { %335 = vmatprep.subr.bf16.mxu0 %v334_v3  ;;  %296 = vmatprep.mubr.f32.mxu0 %v20_v11  ;;  %v122_v12 = vld [vmem:[%s544_s3] sm:$0xff]  ;;  %v123_v13 = vld [vmem:[%s544_s3 + $0x8] sm:$0xff]  ;;  %v124_v14 = vld [vmem:[%s544_s3 + $0x10] sm:$0xff]  ;;  %v346_v20 = vpack.c.bf16 %v29_v10, %v28_v9 }
   0x5   :  { %337 = vmatpush3.bf16.msra.mxu0 %v334_v3  ;;  %v366_v15 = vpack.c.bf16 %v123_v13, %v122_v12  ;;  %v125_v16 = vld [vmem:[%s544_s3 + $0x18] sm:$0xff]  ;;  %v126_v18 = vld [vmem:[%s544_s3 + $0x20] sm:$0xff]  ;;  %v127_v19 = vld [vmem:[%s544_s3 + $0x28] sm:$0xff] }
   0x6   :  { %339 = vmatprep.subr.bf16.mxu0 %v338_v5  ;;  %v370_v17 = vpack.c.bf16 %v125_v16, %v124_v14  ;;  %v30_v21 = vld [vmem:[%s542_s1 + $0x40] sm:$0xff]  ;;  %v31_v22 = vld [vmem:[%s542_s1 + $0x48] sm:$0xff]  ;;  %v374_v23 = vpack.c.bf16 %v127_v19, %v126_v18  ;;  %v128_v24 = vld [vmem:[%s544_s3 + $0x30] sm:$0xff] }
   0x7   :  { %367 = vmatprep.subr.bf16.mxu1 %v366_v15  ;;  %v129_v25 = vld [vmem:[%s544_s3 + $0x38] sm:$0xff]  ;;  %v350_v26 = vpack.c.bf16 %v31_v22, %v30_v21  ;;  %v32_v27 = vld [vmem:[%s542_s1 + $0x50] sm:$0xff]  ;;  %v130_v30 = vld [vmem:[%s544_s3 + $0x40] sm:$0xff] }
   0x8   :  { %369 = vmatpush3.bf16.msra.mxu1 %v366_v15  ;;  %v33_v28 = vld [vmem:[%s542_s1 + $0x58] sm:$0xff]  ;;  %v378_v29 = vpack.c.bf16 %v129_v25, %v128_v24  ;;  %v131_v31 = vld [vmem:[%s544_s3 + $0x48] sm:$0xff]  ;;  %v34_v33 = vld [vmem:[%s542_s1 + $0x60] sm:$0xff] }
   0x9   :  { %341 = vmatpush3.bf16.msra.mxu0 %v338_v5  ;;  %371 = vmatprep.subr.bf16.mxu1 %v370_v17  ;;  %v354_v32 = vpack.c.bf16 %v33_v28, %v32_v27  ;;  %v35_v34 = vld [vmem:[%s542_s1 + $0x68] sm:$0xff]  ;;  %v382_v35 = vpack.c.bf16 %v131_v31, %v130_v30  ;;  %v132_v36 = vld [vmem:[%s544_s3 + $0x50] sm:$0xff]  ;;  %v133_v37 = vld [vmem:[%s544_s3 + $0x58] sm:$0xff] }
   0xa   :  { %343 = vmatprep.subr.bf16.mxu0 %v342_v8  ;;  %v358_v38 = vpack.c.bf16 %v35_v34, %v34_v33  ;;  %v36_v39 = vld [vmem:[%s542_s1 + $0x70] sm:$0xff]  ;;  %v37_v40 = vld [vmem:[%s542_s1 + $0x78] sm:$0xff]  ;;  %v386_v41 = vpack.c.bf16 %v133_v37, %v132_v36  ;;  %v134_v42 = vld [vmem:[%s544_s3 + $0x60] sm:$0xff] }
   0xb   :  { %v135_v43 = vld [vmem:[%s544_s3 + $0x68] sm:$0xff]  ;;  %v362_v44 = vpack.c.bf16 %v37_v40, %v36_v39  ;;  %v136_v47 = vld [vmem:[%s544_s3 + $0x70] sm:$0xff]  ;;  %v137_v48 = vld [vmem:[%s544_s3 + $0x78] sm:$0xff] }
   0xc   :  { %373 = vmatpush3.bf16.msra.mxu1 %v370_v17  ;;  %v390_v45 = vpack.c.bf16 %v135_v43, %v134_v42  ;;  %v21_v46 = vld [vmem:[%s543_s0 + $0x8] sm:$0xff]  ;;  %v394_v49 = vpack.c.bf16 %v137_v48, %v136_v47  ;;  %v226_v50 = vld [vmem:[%s545_s2] ss:$0 sm:$0xff] }
   0xd   :  { %345 = vmatpush3.bf16.msra.mxu0 %v342_v8  ;;  %375 = vmatprep.subr.bf16.mxu1 %v374_v23  ;;  %v227_v57 = vld [vmem:[%s546_s4] ss:$0 sm:$0xff] }
   0xe   :  { %347 = vmatprep.subr.bf16.mxu0 %v346_v20 }
  0x10   :  { %377 = vmatpush3.bf16.msra.mxu1 %v374_v23 }
  0x11   :  { %349 = vmatpush3.bf16.msra.mxu0 %v346_v20  ;;  %379 = vmatprep.subr.bf16.mxu1 %v378_v29 }
  0x12   :  { %351 = vmatprep.subr.bf16.mxu0 %v350_v26 }
  0x14   :  { %381 = vmatpush3.bf16.msra.mxu1 %v378_v29 }
  0x15   :  { %353 = vmatpush3.bf16.msra.mxu0 %v350_v26  ;;  %383 = vmatprep.subr.bf16.mxu1 %v382_v35 }
  0x16   :  { %355 = vmatprep.subr.bf16.mxu0 %v354_v32 }
  0x18   :  { %385 = vmatpush3.bf16.msra.mxu1 %v382_v35 }
  0x19   :  { %357 = vmatpush3.bf16.msra.mxu0 %v354_v32  ;;  %387 = vmatprep.subr.bf16.mxu1 %v386_v41 }
  0x1a   :  { %359 = vmatprep.subr.bf16.mxu0 %v358_v38 }
  0x1c   :  { %389 = vmatpush3.bf16.msra.mxu1 %v386_v41 }
  0x1d   :  { %361 = vmatpush3.bf16.msra.mxu0 %v358_v38  ;;  %391 = vmatprep.subr.bf16.mxu1 %v390_v45 }
  0x1e   :  { %363 = vmatprep.subr.bf16.mxu0 %v362_v44 }
  0x20   :  { %393 = vmatpush3.bf16.msra.mxu1 %v390_v45 }
  0x21   :  { %365 = vmatpush3.bf16.msra.mxu0 %v362_v44  ;;  %395 = vmatprep.subr.bf16.mxu1 %v394_v49 }
  0x24   :  { %297 = vmatmul.mubr.f32.vlgmr.msra.gmra.mrb[0].mxu0 %v21_v46  ;;  %397 = vmatpush3.bf16.msra.mxu1 %v394_v49 }
  0xf7   :  { %v298_v51 = vpop.f32.mrb[0].mxu0 }
  0xf8   :  { %v117_v52 = vadd.f32 %v298_v51, %v226_v50  ;;  %v111_v53 = vpop.f32.mrb[1].mxu0 }
  0xf9   :  { %v112_v54 = vadd.f32 %v226_v50, %v111_v53 }
  0xfa   :  { %v121_v56 = vmax.f32 %v117_v52, 0.0 }
  0xfb   :  { %v120_v55 = vmax.f32 %v112_v54, 0.0 }
  0xfd   :  { %331 = vmatprep.mubr.f32.mxu1 %v120_v55 }
  0xfe   :  { %332 = vmatmul.mubr.f32.vlgmr.msra.gmra.mrb[0].mxu1 %v121_v56 }
 0x1d1   :  { %v333_v58 = vpop.f32.mrb[0].mxu1 }
 0x1d2   :  { %v217_v59 = vadd.f32 %v333_v58, %v227_v57  ;;  %v211_v60 = vpop.f32.mrb[1].mxu1 }
 0x1d3   :  { %v212_v61 = vadd.f32 %v227_v57, %v211_v60 }
 0x1d4   :  { %221 = vst [vmem:[%s547_s5 + $0x8] sm:$0xff] %v217_v59 }
 0x1d5   :  { %220 = vst [vmem:[%s547_s5] sm:$0xff] %v212_v61 }

</bundles_post_ra>
